<compile_context>
chip_gen: v5e
topology: v5e:2x2
jax: 0.10.0
libtpu: 0.0.40
codegen_flags: <defaults>
</compile_context>

<pallas_src>
import functools
import math

import jax
import jax.numpy as jnp
from jax.experimental import pallas as pl
from jax.experimental.pallas import tpu as pltpu


def _round_up(v, m):
    return ((v + m - 1) // m) * m


def _kl_ls_kernel(x_ref, tgt_ref, out_ref, *, pad_idx, confidence, base,
                  h_const, use_mxu_sum):
    x = x_ref[...]                                     # (row_tile, C), f32 or bf16
    tgt = tgt_ref[...]                                 # (row_tile, 1)  int32
    tn, c = x.shape

    xf = x.astype(jnp.float32)                         # no-op for f32 inputs

    # S = sum_c x[r, c].  For bf16 inputs route it through the idle MXU:
    # every product is x*1.0 (exact) with f32 accumulation, so no precision loss.
    if use_mxu_sum:
        ones = jnp.ones((c, 128), dtype=x.dtype)
        s = jnp.dot(x, ones, preferred_element_type=jnp.float32)[:, :1]
    else:
        s = jnp.sum(xf, axis=1, keepdims=True)         # (row_tile, 1)

    # G = x[r, tgt[r]] via a masked sum (exactly one nonzero per row -> exact).
    col = jax.lax.broadcasted_iota(jnp.int32, (tn, c), 1)
    g = jnp.sum(jnp.where(col == tgt, xf, 0.0), axis=1, keepdims=True)

    # P = x[r, pad_idx]: pad_idx is a compile-time constant -> static slice,
    # no per-element compare/select needed for the pad column.
    p = xf[:, pad_idx:pad_idx + 1]

    # Weighted cross term for a non-pad row:
    #   td = confidence at GT col, 0 at pad col, base elsewhere
    #   sum_c td*x = base*S + (confidence-base)*G - base*P
    cross = base * s + (confidence - base) * g - base * p
    row_loss = jnp.float32(h_const) - cross            # (row_tile, 1)

    # Zero pad rows.  The wrapper pads target with pad_idx past the true end of
    # the array, so this single select also kills any garbage read from the
    # ragged tail block of x (jnp.where is a true select: NaN/Inf never leaks).
    row_loss = jnp.where(tgt != pad_idx, row_loss, jnp.float32(0.0))

    # One lane-dense (1, 8, 128) partial-sum block per grid step (no cross-step
    # accumulation -> grid axis stays "parallel"); final sum happens in JAX.
    out_ref[...] = jnp.broadcast_to(jnp.sum(row_loss), out_ref.shape)


def kl_div_with_label_smoothing(x, target, *, n_classes, pad_idx, smoothing=0.0,
                                target_block_bytes=16 * 1024 * 1024):
    """x: (N, n_classes) float32/bfloat16 log-probs; target: (N,) int.

    Returns the scalar un-normalized KL divergence, matching
    nn.KLDivLoss(reduction='sum') against the label-smoothed target.
    Keep x in bf16 on the HBM side when possible: the kernel is a pure HBM
    stream, and the upcast happens in-register inside the kernel.
    """
    n, c = x.shape
    assert c == n_classes
    assert n_classes > 2 or smoothing == 0.0, \
        "smoothing/(n_classes-2) is undefined for n_classes <= 2"

    confidence = 1.0 - smoothing
    base = (smoothing / (n_classes - 2)) if n_classes > 2 else 0.0
    # H_const = sum_c td*log(td) for a non-pad row, with 0*log(0) := 0.
    h_const = 0.0
    if confidence > 0.0:
        h_const += confidence * math.log(confidence)
    if base > 0.0:
        h_const += (n_classes - 2) * base * math.log(base)

    itemsize = jnp.dtype(x.dtype).itemsize
    use_mxu_sum = (x.dtype == jnp.bfloat16)

    # Row tile: big enough to amortize the ~0.35us/step pipeline overhead, but
    # keep (double-buffered HBM block + ~3 block-sized f32 temporaries) inside a
    # conservative 56 MiB working set so the same tiling is safe on v7x's
    # 64 MiB VMEM (v5e/v6e have 128 MiB).
    per_row_working_bytes = n_classes * (2 * itemsize + 3 * 4)
    vmem_budget = 56 * 1024 * 1024
    row_tile = min(target_block_bytes // max(1, n_classes * itemsize),
                   vmem_budget // max(1, per_row_working_bytes))
    row_tile = max(8, (row_tile // 8) * 8)
    row_tile = min(row_tile, _round_up(n, 8))   # don't over-read tiny inputs

    num_tiles = -(-n // row_tile)
    padded_n = num_tiles * row_tile

    # Pad the target with pad_idx to a whole number of tiles: the kernel's
    # tgt != pad_idx select then also masks the ragged x tail, with no iota /
    # row-index compare and no reliance on OOB-tail-block contents.
    tgt2d = jnp.pad(target.astype(jnp.int32), (0, padded_n - n),
                    constant_values=pad_idx).reshape(padded_n, 1)

    kernel = functools.partial(
        _kl_ls_kernel, pad_idx=pad_idx, confidence=confidence, base=base,
        h_const=h_const, use_mxu_sum=use_mxu_sum)

    vmem_limit = int(min(64 * 1024 * 1024,
                         max(32 * 1024 * 1024,
                             row_tile * per_row_working_bytes + (4 << 20))))

    cost = pl.CostEstimate(
        flops=int(5 * n * n_classes),
        transcendentals=0,
        bytes_accessed=int(n * n_classes * itemsize + padded_n * 4
                           + num_tiles * 8 * 128 * 4))

    partials = pl.pallas_call(
        kernel,
        out_shape=jax.ShapeDtypeStruct((num_tiles, 8, 128), jnp.float32),
        grid=(num_tiles,),
        in_specs=[
            pl.BlockSpec((row_tile, n_classes), lambda i: (i, 0)),
            pl.BlockSpec((row_tile, 1), lambda i: (i, 0)),
        ],
        out_specs=pl.BlockSpec((1, 8, 128), lambda i: (i, 0, 0)),
        compiler_params=pltpu.CompilerParams(
            dimension_semantics=("parallel",),
            vmem_limit_bytes=vmem_limit),
        cost_estimate=cost,
    )(x, tgt2d)

    # Per-tile f32 partials summed here (numerically safer than one running
    # scalar, and required for the "parallel" grid axis).
    return jnp.sum(partials[:, 0, 0])


def _reference(x, target, *, n_classes, pad_idx, smoothing):
    # Plain-JAX replica of the torch forward, for a sanity check.
    confidence = 1.0 - smoothing
    n, c = x.shape
    x = x.astype(jnp.float32)
    td = jnp.full((n, c), smoothing / (n_classes - 2), dtype=jnp.float32)
    td = td.at[jnp.arange(n), target].set(confidence)
    td = td.at[:, pad_idx].set(0.0)
    td = jnp.where((target == pad_idx)[:, None], 0.0, td)
    elt = jnp.where(td > 0.0, td * (jnp.log(jnp.where(td > 0, td, 1.0)) - x), 0.0)
    return jnp.sum(elt)


if __name__ == "__main__":
    PAD_IDX = 0
    SMOOTHING = 0.1

    # Check 1: small shape consistent with the module: 8 tokens, 32 classes, f32.
    N, C = 8, 32
    kx, kt = jax.random.split(jax.random.PRNGKey(0))
    logits = jax.random.normal(kx, (N, C), dtype=jnp.float32)
    x = jax.nn.log_softmax(logits, axis=-1)              # KLDivLoss expects log-probs
    target = jax.random.randint(kt, (N,), 0, C, dtype=jnp.int32)
    target = target.at[3].set(PAD_IDX)                   # exercise pad-row masking

    loss = kl_div_with_label_smoothing(
        x, target, n_classes=C, pad_idx=PAD_IDX, smoothing=SMOOTHING)
    loss = jax.block_until_ready(loss)
    ref = _reference(x, target, n_classes=C, pad_idx=PAD_IDX, smoothing=SMOOTHING)
    assert jnp.allclose(loss, ref, rtol=1e-5, atol=1e-5), (loss, ref)

    # Check 2: multi-tile grid ("parallel" axis) + padded ragged tail, f32.
    N2, C2 = 300, 512
    kx2, kt2 = jax.random.split(jax.random.PRNGKey(1))
    x2 = jax.nn.log_softmax(jax.random.normal(kx2, (N2, C2), jnp.float32), axis=-1)
    target2 = jax.random.randint(kt2, (N2,), 0, C2, dtype=jnp.int32)
    target2 = target2.at[::7].set(PAD_IDX)
    loss2 = kl_div_with_label_smoothing(
        x2, target2, n_classes=C2, pad_idx=PAD_IDX, smoothing=SMOOTHING,
        target_block_bytes=64 * 1024)                    # force several grid tiles
    loss2 = jax.block_until_ready(loss2)
    ref2 = _reference(x2, target2, n_classes=C2, pad_idx=PAD_IDX, smoothing=SMOOTHING)
    assert jnp.allclose(loss2, ref2, rtol=1e-5, atol=1e-4), (loss2, ref2)

    # Check 3: bf16 input exercises the MXU-ones dense-sum path.
    N3, C3 = 128, 256
    kx3, kt3 = jax.random.split(jax.random.PRNGKey(2))
    x3 = jax.nn.log_softmax(jax.random.normal(kx3, (N3, C3), jnp.float32), axis=-1)
    x3 = x3.astype(jnp.bfloat16)
    target3 = jax.random.randint(kt3, (N3,), 0, C3, dtype=jnp.int32)
    target3 = target3.at[::5].set(PAD_IDX)
    loss3 = kl_div_with_label_smoothing(
        x3, target3, n_classes=C3, pad_idx=PAD_IDX, smoothing=SMOOTHING)
    loss3 = jax.block_until_ready(loss3)
    ref3 = _reference(x3, target3, n_classes=C3, pad_idx=PAD_IDX, smoothing=SMOOTHING)
    assert jnp.allclose(loss3, ref3, rtol=1e-3, atol=1e-2), (loss3, ref3)

    print("KERNEL_OK")
</pallas_src>

<mosaic_0001>
module attributes {stable_mosaic.version = 11 : i64} {
  func.func @_kl_ls_kernel(%arg0: i32, %arg1: memref<8x32xf32, #tpu.memory_space<vmem>>, %arg2: memref<8x1xi32, #tpu.memory_space<vmem>>, %arg3: memref<1x8x128xf32, #tpu.memory_space<vmem>>) attributes {dimension_semantics = [#tpu.dimension_semantics<parallel>], iteration_bounds = array<i64: 1>, scalar_prefetch = 0 : i64, scratch_operands = 0 : i64, tpu.core_type = #tpu.core_type<tc>, window_params = [{transform_indices = @transform_0, window_bounds = array<i64: 8, 32>}, {transform_indices = @transform_1, window_bounds = array<i64: 8, 1>}, {transform_indices = @transform_2, window_bounds = array<i64: 1, 8, 128>}]} {
    %c0 = arith.constant 0 : index
    %c0_0 = arith.constant 0 : index
    %0 = vector.load %arg1[%c0, %c0_0] : memref<8x32xf32, #tpu.memory_space<vmem>>, vector<8x32xf32>
    %c0_1 = arith.constant 0 : index
    %c0_2 = arith.constant 0 : index
    %1 = vector.load %arg2[%c0_1, %c0_2] : memref<8x1xi32, #tpu.memory_space<vmem>>, vector<8x1xi32>
    %cst = arith.constant dense<0.000000e+00> : vector<8xf32>
    %2 = vector.multi_reduction <add>, %0, %cst [1] : vector<8x32xf32> to vector<8xf32>
    %3 = vector.shape_cast %2 : vector<8xf32> to vector<8x1xf32>
    %4 = tpu.iota {dimensions = array<i32: 1>} : vector<8x32xi32>
    %5 = vector.broadcast %1 : vector<8x1xi32> to vector<8x32xi32>
    %6 = arith.cmpi eq, %4, %5 : vector<8x32xi32>
    %cst_3 = arith.constant 0.000000e+00 : f32
    %7 = vector.broadcast %cst_3 : f32 to vector<8x32xf32>
    %8 = arith.select %6, %0, %7 : vector<8x32xi1>, vector<8x32xf32>
    %cst_4 = arith.constant dense<0.000000e+00> : vector<8xf32>
    %9 = vector.multi_reduction <add>, %8, %cst_4 [1] : vector<8x32xf32> to vector<8xf32>
    %10 = vector.shape_cast %9 : vector<8xf32> to vector<8x1xf32>
    %11 = vector.extract_strided_slice %0 {offsets = [0, 0], sizes = [8, 1], strides = [1, 1]} : vector<8x32xf32> to vector<8x1xf32>
    %cst_5 = arith.constant 0.00333333341 : f32
    %12 = vector.broadcast %cst_5 : f32 to vector<8x1xf32>
    %13 = arith.mulf %12, %3 : vector<8x1xf32>
    %cst_6 = arith.constant 0.896666646 : f32
    %14 = vector.broadcast %cst_6 : f32 to vector<8x1xf32>
    %15 = arith.mulf %14, %10 : vector<8x1xf32>
    %16 = arith.addf %13, %15 : vector<8x1xf32>
    %cst_7 = arith.constant 0.00333333341 : f32
    %17 = vector.broadcast %cst_7 : f32 to vector<8x1xf32>
    %18 = arith.mulf %17, %11 : vector<8x1xf32>
    %19 = arith.subf %16, %18 : vector<8x1xf32>
    %cst_8 = arith.constant -0.665202737 : f32
    %20 = vector.broadcast %cst_8 : f32 to vector<8x1xf32>
    %21 = arith.subf %20, %19 : vector<8x1xf32>
    %c0_i32 = arith.constant 0 : i32
    %22 = vector.broadcast %c0_i32 : i32 to vector<8x1xi32>
    %23 = arith.cmpi ne, %1, %22 : vector<8x1xi32>
    %cst_9 = arith.constant 0.000000e+00 : f32
    %24 = vector.broadcast %cst_9 : f32 to vector<8x1xf32>
    %25 = arith.select %23, %21, %24 : vector<8x1xi1>, vector<8x1xf32>
    %26 = vector.shape_cast %25 : vector<8x1xf32> to vector<1x8x1xf32>
    %cst_10 = arith.constant dense<0.000000e+00> : vector<1xf32>
    %27 = vector.multi_reduction <add>, %26, %cst_10 [1, 2] : vector<1x8x1xf32> to vector<1xf32>
    %28 = vector.shape_cast %27 : vector<1xf32> to vector<1x1x1xf32>
    %29 = vector.extract %28[0, 0, 0] : f32 from vector<1x1x1xf32>
    %30 = vector.broadcast %29 : f32 to vector<1x8x128xf32>
    %c0_11 = arith.constant 0 : index
    %c0_12 = arith.constant 0 : index
    %c0_13 = arith.constant 0 : index
    %31 = vector.load %arg3[%c0_11, %c0_12, %c0_13] : memref<1x8x128xf32, #tpu.memory_space<vmem>>, vector<1x8x128xf32>
    tpu.vector_store %arg3[%c0_11, %c0_12, %c0_13], %30 {strides = array<i32>} : memref<1x8x128xf32, #tpu.memory_space<vmem>>, vector<1x8x128xf32>,
    return
  }
  func.func @transform_0(%arg0: i32) -> (i32, i32) {
    %c0_i32 = arith.constant 0 : i32
    %c0_i32_0 = arith.constant 0 : i32
    return %arg0, %c0_i32 : i32, i32
  }
  func.func @transform_1(%arg0: i32) -> (i32, i32) {
    %c0_i32 = arith.constant 0 : i32
    %c0_i32_0 = arith.constant 0 : i32
    return %arg0, %c0_i32 : i32, i32
  }
  func.func @transform_2(%arg0: i32) -> (i32, i32, i32) {
    %c0_i32 = arith.constant 0 : i32
    %c0_i32_0 = arith.constant 0 : i32
    %c0_i32_1 = arith.constant 0 : i32
    return %arg0, %c0_i32, %c0_i32_0 : i32, i32, i32
  }
}

</mosaic_0001>

<bundles_post_ra>
// kernel: tpu_custom_call.1
= control target key start
LH: loop header
LB: loop body
LE: loop exit
PB: predicated region body
PF: predicated region fallthrough
CT: control target
= control target key end

     0   :  { %s122_s0 = inlined_call_operand.vmem [shape: f32[8,32], index: 0, kind: input, shape index: {}]   ;;  %s123_s1 = inlined_call_operand.vmem [shape: s32[8,1], index: 1, kind: input, shape index: {}]   ;;  %s124_s2 = inlined_call_operand.hbm [shape: f32[1,8,128], index: 2, kind: output, shape index: {}]  }
   0x1   :  { %v13_v0 = vld [vmem:[%s123_s1] sm:$0xff] }
   0x2   :  { %7 = vsyncpa [#allocation3], 0  ;;  %v96_v1 = vmov 0   ;;  %v12_v2 = vld [vmem:[%s122_s0] sm:$0xff]  ;;  %vm14_vm0 = vcmask 261120   ;;  %v18_v4 = vlaneseq  ;;  %vm34_vm2 = vcmp.ne.s32.totalorder %v13_v0, 0 }
   0x3   :  { %69 = vset.pattern.permute.xlu0 %v96_v1  ;;  %v15_v3 = vsel %vm14_vm0, %v12_v2, 0.0  ;;  %v31_v12 = vmul.f32 0.0033333334, %v12_v2  ;;  %vm36_vm3 = vcmask 7168   ;;  %s97_s0 = smov [#allocation2]   ;;  %s56_s15 = sshll.u32 %s124_s2, 4  ;;  %s57_s15 = int_to_ptr.hbm [resolvable:$true] %s56_s15 }
   0x4   :  { %21 = vperm.xlu0 %69, %v13_v0   ;;  %v19_v5 = vand.u32 127, %v18_v4  ;;  %s54_s1 = sshll.u32 %s97_s0, 4  ;;  %s55_s1 = int_to_ptr.vmem [resolvable:$true] %s54_s1 }
  0x2e   :  { %16 = vadd.xlane.f32.xlu0 %v15_v3 }
  0x76   :  { %v22_v6 = vpop.permute.xlu0 %21 }
  0x77   :  { %vm23_vm1 = vcmp.eq.s32.totalorder %v19_v5, %v22_v6 }
  0x78   :  { %v24_v7 = vsel %vm23_vm1, %v12_v2, 0.0 }
  0x79   :  { %v25_v8 = vsel %vm14_vm0, %v24_v7, 0.0 }
  0x7a   :  { %26 = vadd.xlane.f32.xlu1 %v25_v8 }
  0xa1   :  { %v17_v9 = vpop.xlane.xlu0 %16 }
  0xa2   :  { %v28_v10 = vmul.f32 0.0033333334, %v17_v9 }
  0xed   :  { %v27_v11 = vpop.xlane.xlu1 %26 }
  0xee   :  { %v29_v13 = vmul.f32 0.89666665, %v27_v11 }
  0xf0   :  { %v30_v14 = vadd.f32 %v29_v13, %v28_v10 }
  0xf2   :  { %v32_v15 = vsub.f32 %v30_v14, %v31_v12 }
  0xf4   :  { %v33_v16 = vsub.f32 -0.66520274, %v32_v15 }
  0xf6   :  { %v35_v17 = vsel %vm34_vm2, %v33_v16, 0.0 }
  0xf7   :  { %v37_v18 = vsel %vm36_vm3, %v35_v17, 0.0 }
  0xf8   :  { %38 = vadd.xlane.f32.xlu1 %v37_v18 }
 0x16b   :  { %v39_v19 = vpop.xlane.xlu1 %38 }
 0x16c   :  { %v40_v20 = vrot.slane %v39_v19, 4 }
 0x16e   :  { %v41_v21 = vadd.f32 %v40_v20, %v39_v19 }
 0x170   :  { %v42_v22 = vrot.slane %v41_v21, 2 }
 0x172   :  { %v43_v23 = vadd.f32 %v42_v22, %v41_v21 }
 0x174   :  { %v44_v24 = vrot.slane %v43_v23, 1 }
 0x176   :  { %v45_v25 = vadd.f32 %v44_v24, %v43_v23 }
 0x178   :  { %65 = vpush %v45_v25 }
 0x1a9   :  { %s66_s16 = spop %65 }
 0x1aa   :  { %v47_v26 = vstv %s66_s16 }
 0x1ab   :  { %48 = vst [vmem:[#allocation2] sm:$0xff] %v47_v26 }
 0x1ac   :  { %59 = dma.vmem_to_hbm [thread:$0]  %s55_s1, 128, %s57_s15, [#allocation3]  }
 0x1ad   :  { %94 = dma.done.wait [#allocation3], 128  }
 0x1ae   :  { %95 = vsyncadd [#allocation3], 4294967168 }
 0x1af   :  { %64 = vsyncpa [#allocation3], 1 }

</bundles_post_ra>
